<compile_context>
chip_gen: v6e
topology: v6e:2x2x1
jax: 0.10.0
libtpu: 0.0.40
codegen_flags: <defaults>
</compile_context>

<pallas_src>
import functools
import numpy as np
import jax
import jax.numpy as jnp
from jax.experimental import pallas as pl
from jax.experimental.pallas import tpu as pltpu


def _round_up(n: int, m: int) -> int:
    return ((n + m - 1) // m) * m


def _choose_batch_tile(batch: int, cap: int = 512) -> int:
    """Adaptive batch tile (multiple of 8, capped, >=2 tiles for big batches)."""
    base = _round_up(max(batch, 1), 8)
    n_tiles = -(-base // cap)                      # ceil(base / cap)
    if n_tiles == 1 and base >= 256:
        n_tiles = 2                                # feed v7x's second TensorCore
    return _round_up(-(-base // n_tiles), 8)


# ---------------------------------------------------------------------------
# Fused kernel:  out = exp(-cdist(x, C)^2) @ W^T + b
#   x_ref  : (Bt, D_in)      batch tile of inputs (f32)
#   ct_ref : (D_in, F_pad)   2 * centers^T, F zero-padded (f32)
#   nc2_ref: (1, F_pad)      -||c||^2 per center (f32)
#   wt_ref : (F_pad, O_pad)  linear weight^T, zero-padded (bf16)
#   b_ref  : (1, O_pad)      bias, zero-padded (f32)
#   out_ref: (Bt, O_pad)     (f32, lane-dense store)
# ---------------------------------------------------------------------------
def _fhrbf_kernel(x_ref, ct_ref, nc2_ref, wt_ref, b_ref, out_ref):
    x = x_ref[...]                                                    # (Bt, D)
    # 2 * x . C^T on the MXU (scale folded into ct at init).  Kept f32: this
    # term feeds exp(-d^2), which amplifies mantissa loss.
    xc = jnp.dot(x, ct_ref[...], preferred_element_type=jnp.float32)  # (Bt, F)
    # ||x||^2 per row (VPU mul + XLU lane-reduce; tiny).
    x2 = jnp.sum(x * x, axis=1, keepdims=True)                        # (Bt, 1)
    # -d^2 = 2 x.c - ||x||^2 - ||c||^2, clamped to <= 0 for numerical safety.
    neg_d2 = jnp.minimum(xc - x2 + nc2_ref[...], 0.0)                 # (Bt, F)
    rbf = jnp.exp(neg_d2)                                             # EUP
    # Dominant F_p x O_p matmul with bf16 feeds, f32 accumulation.  Padded F
    # rows of wt are zero so padded RBF features contribute nothing.
    out_ref[...] = (
        jnp.dot(rbf.astype(jnp.bfloat16), wt_ref[...],
                preferred_element_type=jnp.float32)
        + b_ref[...]
    )


# ---------------------------------------------------------------------------
# Jitted forward wrapper (one fused pallas_call per forward).
# ---------------------------------------------------------------------------
@functools.partial(jax.jit, static_argnames=("num_outputs", "batch_tile"))
def _fhrbf_forward(x, ct, nc2, wt, b, *, num_outputs: int, batch_tile: int):
    B, D_in = x.shape
    F_p = ct.shape[1]
    O_p = wt.shape[1]
    Bt = batch_tile
    B_p = _round_up(B, Bt)

    # Only pad the batch when the last tile is ragged (avoids an extra HBM
    # read+write of x as a separate XLA op for the common aligned case).
    x_p = x if B_p == B else jnp.pad(x, ((0, B_p - B), (0, 0)))

    # Advisory cost estimate for XLA's scheduler.
    flops = 2 * B_p * F_p * (D_in + O_p) + 6 * B_p * F_p
    bytes_accessed = ((B_p * D_in + B_p * O_p + D_in * F_p + F_p + O_p) * 4
                      + F_p * O_p * 2)
    cost = pl.CostEstimate(flops=flops,
                           transcendentals=B_p * F_p,
                           bytes_accessed=bytes_accessed)

    # Raise the scoped-VMEM limit only when the footprint actually needs it
    # (big batch tiles / big F, O); defaults are 16 MiB (v5e) / 32 MiB (v6e/7x).
    resident = (D_in * F_p + F_p + O_p) * 4 + F_p * O_p * 2
    per_step = (Bt * D_in + Bt * O_p) * 4
    vmem_need = 2 * per_step + 2 * resident + (1 << 20)
    vmem_limit = None
    if vmem_need > 12 * 1024 * 1024:
        vmem_limit = int(min(max(2 * vmem_need, 32 * 1024 * 1024),
                             100 * 1024 * 1024))

    out = pl.pallas_call(
        _fhrbf_kernel,
        grid=(B_p // Bt,),
        in_specs=[
            pl.BlockSpec((Bt, D_in), lambda i: (i, 0)),   # x: tiled on batch
            pl.BlockSpec((D_in, F_p), lambda i: (0, 0)),  # 2*C^T (resident)
            pl.BlockSpec((1, F_p), lambda i: (0, 0)),     # -||c||^2
            pl.BlockSpec((F_p, O_p), lambda i: (0, 0)),   # W^T bf16 (resident)
            pl.BlockSpec((1, O_p), lambda i: (0, 0)),     # bias
        ],
        out_specs=pl.BlockSpec((Bt, O_p), lambda i: (i, 0)),
        out_shape=jax.ShapeDtypeStruct((B_p, O_p), jnp.float32),
        cost_estimate=cost,
        compiler_params=pltpu.CompilerParams(
            dimension_semantics=("parallel",),
            vmem_limit_bytes=vmem_limit),
    )(x_p, ct, nc2, wt, b)

    return out[:B, :num_outputs]


# ---------------------------------------------------------------------------
# Module wrapper mirroring FHRBFmodel (H heads, each: RBF features + Linear)
# ---------------------------------------------------------------------------
class FHRBFmodel:
    def __init__(self, num_inputs, num_rbf_features, num_outputs, H,
                 seed: int = 0, batch_tile_cap: int = 512):
        self.num_inputs = int(num_inputs)
        self.num_rbf_features = int(num_rbf_features)
        self.num_outputs = int(num_outputs)
        self.H = int(H)
        self.batch_tile_cap = int(batch_tile_cap)

        F_p = _round_up(self.num_rbf_features, 128)   # lane-dense RBF dim
        O_p = _round_up(self.num_outputs, 128)        # lane-dense output dim
        self._F_p, self._O_p = F_p, O_p

        key = jax.random.PRNGKey(seed)
        bound = 1.0 / np.sqrt(self.num_rbf_features)  # torch.nn.Linear init

        # Raw (unpadded, torch-layout, f32) parameters for the reference path.
        self.centers_h, self.weight_h, self.bias_h = [], [], []
        # Padded, pre-transposed / pre-scaled parameters for the kernel.
        self._ct_h, self._nc2_h, self._wt_h, self._b_h = [], [], [], []

        for _ in range(self.H):
            key, kc, kw, kb = jax.random.split(key, 4)
            # Deterministic synthetic stand-in for torch.randn centers (scaled
            # so exp(-d^2) lands in a numerically meaningful range; semantics
            # of the forward are unchanged).
            centers = 0.3 * jax.random.normal(
                kc, (self.num_rbf_features, self.num_inputs), jnp.float32)
            weight = jax.random.uniform(
                kw, (self.num_outputs, self.num_rbf_features), jnp.float32,
                minval=-bound, maxval=bound)
            bias = jax.random.uniform(
                kb, (self.num_outputs,), jnp.float32,
                minval=-bound, maxval=bound)

            self.centers_h.append(centers)
            self.weight_h.append(weight)
            self.bias_h.append(bias)

            # 2 * centers^T : (D_in, F_pad), zero-padded F columns.
            ct = jnp.pad(2.0 * centers.T,
                         ((0, 0), (0, F_p - self.num_rbf_features)))
            # -||c||^2 per center : (1, F_pad).
            nc2 = jnp.pad(-jnp.sum(centers * centers, axis=1)[None, :],
                          ((0, 0), (0, F_p - self.num_rbf_features)))
            # W^T in bf16 : (F_pad, O_pad); zero rows for padded features,
            # zero cols for padded outputs.
            wt = jnp.pad(weight.T, ((0, F_p - self.num_rbf_features),
                                    (0, O_p - self.num_outputs))
                         ).astype(jnp.bfloat16)
            bb = jnp.pad(bias[None, :], ((0, 0), (0, O_p - self.num_outputs)))

            self._ct_h.append(ct)
            self._nc2_h.append(nc2)
            self._wt_h.append(wt)
            self._b_h.append(bb)

    # -- pure-JAX references (f32, full precision) --------------------------
    def radial_basis_ref(self, x, h):
        if x.ndim == 1:
            x = x[None, :]
        diff = x[:, None, :] - self.centers_h[h][None, :, :]
        d2 = jnp.sum(diff * diff, axis=-1)
        return jnp.squeeze(jnp.exp(-d2))

    def forward_ref(self, x, h):
        x = jnp.asarray(np.asarray(x), dtype=jnp.float32)
        rbf = self.radial_basis_ref(x, h)
        return rbf @ self.weight_h[h].T + self.bias_h[h]

    # -- fused Pallas forward ------------------------------------------------
    def __call__(self, x, h):
        x_np = np.asarray(x, dtype=np.float32)
        was_1d = (x_np.ndim == 1)
        if was_1d:
            x_np = x_np[None, :]
        B = x_np.shape[0]
        bt = _choose_batch_tile(B, self.batch_tile_cap)
        out = _fhrbf_forward(
            jnp.asarray(x_np),
            self._ct_h[h], self._nc2_h[h], self._wt_h[h], self._b_h[h],
            num_outputs=self.num_outputs, batch_tile=bt)
        # torch's .squeeze() collapses a batch of one to a vector.
        return out[0] if (was_1d or B == 1) else out


# ---------------------------------------------------------------------------
if __name__ == "__main__":
    num_inputs = 16
    num_rbf_features = 64
    num_outputs = 32
    H = 2

    model = FHRBFmodel(num_inputs, num_rbf_features, num_outputs, H, seed=0)

    key = jax.random.PRNGKey(0)
    k1, k2, k3 = jax.random.split(key, 3)
    # Small-scale inputs so exp(-dist^2) is in a meaningful range.
    x_batch = np.asarray(0.3 * jax.random.normal(k1, (8, num_inputs),
                                                 jnp.float32))
    x_large = np.asarray(0.3 * jax.random.normal(k2, (300, num_inputs),
                                                 jnp.float32))
    x_single = np.asarray(0.3 * jax.random.normal(k3, (num_inputs,),
                                                  jnp.float32))

    # Tolerances reflect bf16 feeds (f32 accumulation) on the F x O matmul.
    RTOL, ATOL = 2e-3, 2e-3

    # Case 1: small batched input, head 0 -> (8, num_outputs)
    out1 = jax.block_until_ready(model(x_batch, 0))
    ref1 = model.forward_ref(x_batch, 0)
    np.testing.assert_allclose(np.asarray(out1), np.asarray(ref1),
                               rtol=RTOL, atol=ATOL)

    # Case 2: larger batch (exercises adaptive tile, multi-step grid, and the
    # ragged-last-tile padding branch), head 0 -> (300, num_outputs)
    out2 = jax.block_until_ready(model(x_large, 0))
    ref2 = model.forward_ref(x_large, 0)
    np.testing.assert_allclose(np.asarray(out2), np.asarray(ref2),
                               rtol=RTOL, atol=ATOL)

    # Case 3: single (1-D) input, head 1 -> (num_outputs,)
    out3 = jax.block_until_ready(model(x_single, 1))
    ref3 = model.forward_ref(x_single, 1)
    np.testing.assert_allclose(np.asarray(out3), np.asarray(ref3),
                               rtol=RTOL, atol=ATOL)

    print("KERNEL_OK")
</pallas_src>

<mosaic_0001>
module attributes {stable_mosaic.version = 11 : i64} {
  func.func @_fhrbf_kernel(%arg0: i32, %arg1: memref<8x16xf32, #tpu.memory_space<vmem>>, %arg2: memref<16x128xf32, #tpu.memory_space<vmem>>, %arg3: memref<1x128xf32, #tpu.memory_space<vmem>>, %arg4: memref<128x128xbf16, #tpu.memory_space<vmem>>, %arg5: memref<1x128xf32, #tpu.memory_space<vmem>>, %arg6: memref<8x128xf32, #tpu.memory_space<vmem>>) attributes {dimension_semantics = [#tpu.dimension_semantics<parallel>], iteration_bounds = array<i64: 1>, scalar_prefetch = 0 : i64, scratch_operands = 0 : i64, tpu.core_type = #tpu.core_type<tc>, window_params = [{transform_indices = @transform_0, window_bounds = array<i64: 8, 16>}, {pipeline_mode = #tpu.pipeline_mode<synchronous>, transform_indices = @transform_1, window_bounds = array<i64: 16, 128>}, {pipeline_mode = #tpu.pipeline_mode<synchronous>, transform_indices = @transform_2, window_bounds = array<i64: 1, 128>}, {pipeline_mode = #tpu.pipeline_mode<synchronous>, transform_indices = @transform_3, window_bounds = array<i64: 128, 128>}, {pipeline_mode = #tpu.pipeline_mode<synchronous>, transform_indices = @transform_4, window_bounds = array<i64: 1, 128>}, {transform_indices = @transform_5, window_bounds = array<i64: 8, 128>}]} {
    %c0 = arith.constant 0 : index
    %c0_0 = arith.constant 0 : index
    %0 = vector.load %arg1[%c0, %c0_0] : memref<8x16xf32, #tpu.memory_space<vmem>>, vector<8x16xf32>
    %c0_1 = arith.constant 0 : index
    %c0_2 = arith.constant 0 : index
    %1 = vector.load %arg2[%c0_1, %c0_2] : memref<16x128xf32, #tpu.memory_space<vmem>>, vector<16x128xf32>
    %cst = arith.constant dense<0.000000e+00> : vector<8x128xf32>
    %2 = tpu.matmul %0, %1, %cst {dimension_numbers = #tpu.dot_dimension_numbers<[1], [0], [0], [1], [0, 0, 1, 1], [], []>} : vector<8x16xf32>, vector<16x128xf32>, vector<8x128xf32> -> vector<8x128xf32>
    %3 = arith.mulf %0, %0 : vector<8x16xf32>
    %cst_3 = arith.constant dense<0.000000e+00> : vector<8xf32>
    %4 = vector.multi_reduction <add>, %3, %cst_3 [1] : vector<8x16xf32> to vector<8xf32>
    %5 = vector.shape_cast %4 : vector<8xf32> to vector<8x1xf32>
    %6 = vector.broadcast %5 : vector<8x1xf32> to vector<8x128xf32>
    %7 = arith.subf %2, %6 : vector<8x128xf32>
    %c0_4 = arith.constant 0 : index
    %c0_5 = arith.constant 0 : index
    %8 = vector.load %arg3[%c0_4, %c0_5] : memref<1x128xf32, #tpu.memory_space<vmem>>, vector<1x128xf32>
    %9 = vector.broadcast %8 : vector<1x128xf32> to vector<8x128xf32>
    %10 = arith.addf %7, %9 : vector<8x128xf32>
    %cst_6 = arith.constant 0.000000e+00 : f32
    %11 = vector.broadcast %cst_6 : f32 to vector<8x128xf32>
    %12 = arith.minimumf %10, %11 : vector<8x128xf32>
    %13 = math.exp %12 : vector<8x128xf32>
    %14 = arith.truncf %13 : vector<8x128xf32> to vector<8x128xbf16>
    %c0_7 = arith.constant 0 : index
    %c0_8 = arith.constant 0 : index
    %15 = vector.load %arg4[%c0_7, %c0_8] : memref<128x128xbf16, #tpu.memory_space<vmem>>, vector<128x128xbf16>
    %cst_9 = arith.constant dense<0.000000e+00> : vector<8x128xf32>
    %16 = tpu.matmul %14, %15, %cst_9 {dimension_numbers = #tpu.dot_dimension_numbers<[1], [0], [0], [1], [0, 0, 1, 1], [], []>} : vector<8x128xbf16>, vector<128x128xbf16>, vector<8x128xf32> -> vector<8x128xf32>
    %c0_10 = arith.constant 0 : index
    %c0_11 = arith.constant 0 : index
    %17 = vector.load %arg5[%c0_10, %c0_11] : memref<1x128xf32, #tpu.memory_space<vmem>>, vector<1x128xf32>
    %18 = vector.broadcast %17 : vector<1x128xf32> to vector<8x128xf32>
    %19 = arith.addf %16, %18 : vector<8x128xf32>
    %c0_12 = arith.constant 0 : index
    %c0_13 = arith.constant 0 : index
    %20 = vector.load %arg6[%c0_12, %c0_13] : memref<8x128xf32, #tpu.memory_space<vmem>>, vector<8x128xf32>
    tpu.vector_store %arg6[%c0_12, %c0_13], %19 {strides = array<i32>} : memref<8x128xf32, #tpu.memory_space<vmem>>, vector<8x128xf32>,
    return
  }
  func.func @transform_0(%arg0: i32) -> (i32, i32) {
    %c0_i32 = arith.constant 0 : i32
    %c0_i32_0 = arith.constant 0 : i32
    return %arg0, %c0_i32 : i32, i32
  }
  func.func @transform_1(%arg0: i32) -> (i32, i32) {
    %c0_i32 = arith.constant 0 : i32
    %c0_i32_0 = arith.constant 0 : i32
    %c0_i32_1 = arith.constant 0 : i32
    return %c0_i32, %c0_i32_0 : i32, i32
  }
  func.func @transform_2(%arg0: i32) -> (i32, i32) {
    %c0_i32 = arith.constant 0 : i32
    %c0_i32_0 = arith.constant 0 : i32
    %c0_i32_1 = arith.constant 0 : i32
    return %c0_i32, %c0_i32_0 : i32, i32
  }
  func.func @transform_3(%arg0: i32) -> (i32, i32) {
    %c0_i32 = arith.constant 0 : i32
    %c0_i32_0 = arith.constant 0 : i32
    %c0_i32_1 = arith.constant 0 : i32
    return %c0_i32, %c0_i32_0 : i32, i32
  }
  func.func @transform_4(%arg0: i32) -> (i32, i32) {
    %c0_i32 = arith.constant 0 : i32
    %c0_i32_0 = arith.constant 0 : i32
    %c0_i32_1 = arith.constant 0 : i32
    return %c0_i32, %c0_i32_0 : i32, i32
  }
  func.func @transform_5(%arg0: i32) -> (i32, i32) {
    %c0_i32 = arith.constant 0 : i32
    %c0_i32_0 = arith.constant 0 : i32
    return %arg0, %c0_i32 : i32, i32
  }
}

</mosaic_0001>

<bundles_post_ra>
// kernel: _fhrbf_forward.1
= control target key start
LH: loop header
LB: loop body
LE: loop exit
PB: predicated region body
PF: predicated region fallthrough
CT: control target
= control target key end

     0   :  { %10 = vsyncpa [#allocation3], 0  ;;  %s497_s0 = inlined_call_operand.hbm [shape: f32[8,16], index: 0, kind: input, shape index: {}]   ;;  %s498_s1 = inlined_call_operand.hbm [shape: f32[16,128], index: 1, kind: input, shape index: {}]   ;;  %s499_s2 = inlined_call_operand.vmem [shape: f32[1,128], index: 2, kind: input, shape index: {}]   ;;  %s500_s3 = inlined_call_operand.hbm [shape: bf16[128,128], index: 3, kind: input, shape index: {}]   ;;  %s501_s4 = inlined_call_operand.vmem [shape: f32[1,128], index: 4, kind: input, shape index: {}]   ;;  %s502_s5 = inlined_call_operand.hbm [shape: f32[8,128], index: 5, kind: output, shape index: {}]  }
   0x1   :  { %11 = vsyncpa [#allocation6], 0 }
   0x2   :  { %12 = vsyncpa [#allocation4], 0  ;;  %s439_s18 = smov [#allocation5]  }
   0x3   :  { %s28_s19 = sshll.u32 %s439_s18, 4  ;;  %s29_s19 = int_to_ptr.vmem [resolvable:$true] %s28_s19 }
   0x4   :  { %s361_s20 = scalar_lea.vmem %s29_s19, 256  ;;  %p366_p1 = scmp.lt.s32.totalorder %s29_s19, %s29_s19 }
   0x5   :  { %p362_p0 = scmp.ne.s32.totalorder %s29_s19, %s361_s20  ;;  %p367_p2 = scmp.lt.s32.totalorder %s361_s20, %s361_s20 }
   0x7   :  { %p368_p3 = por %p367_p2, %p366_p1 }
   0x9   :  { %p369_p4 = pnand %p368_p3, %p362_p0 }
   0xb   :  { %372 = shalt.err (!%p369_p4)
}
   0xc   :  { %s440_s21 = smov 128   ;;  %s441_s22 = smov 8  }
   0xd   :  { %34 = dma.hbm_to_vmem [thread:$0]  %s498_s1, 256, %s29_s19, [#allocation6], %s440_s21, %s440_s21, %s441_s22  }
   0xe   :  { %s442_s25 = smov [#allocation2]   ;;  %s443_s27 = smov [#allocation7]  }
   0xf   :  { %s19_s26 = sshll.u32 %s442_s25, 4  ;;  %s42_s28 = sshll.u32 %s443_s27, 4  ;;  %s20_s26 = int_to_ptr.vmem [resolvable:$true] %s19_s26  ;;  %s43_s28 = int_to_ptr.vmem [resolvable:$true] %s42_s28 }
  0x10   :  { %s381_s29 = scalar_lea.vmem %s20_s26, 128  ;;  %p386_p6 = scmp.lt.s32.totalorder %s20_s26, %s20_s26 }
  0x11   :  { %p382_p5 = scmp.ne.s32.totalorder %s20_s26, %s381_s29  ;;  %p387_p7 = scmp.lt.s32.totalorder %s381_s29, %s381_s29 }
  0x13   :  { %p388_p8 = por %p387_p7, %p386_p6 }
  0x15   :  { %p389_p9 = pnand %p388_p8, %p382_p5 }
  0x17   :  { %392 = shalt.err (!%p389_p9)
}
  0x18   :  { %22 = dma.hbm_to_vmem [thread:$0]  %s497_s0, 128, %s20_s26, [#allocation3]  }
  0x19   :  { %s401_s7 = scalar_lea.vmem %s43_s28, 1024  ;;  %p406_p11 = scmp.lt.s32.totalorder %s43_s28, %s43_s28 }
  0x1a   :  { %p402_p10 = scmp.ne.s32.totalorder %s43_s28, %s401_s7  ;;  %p407_p12 = scmp.lt.s32.totalorder %s401_s7, %s401_s7 }
  0x1c   :  { %p408_p13 = por %p407_p12, %p406_p11 }
  0x1e   :  { %p409_p0 = pnand %p408_p13, %p402_p10 }
  0x20   :  { %412 = shalt.err (!%p409_p0)
}
  0x21   :  { %s444_s1 = smov 64   ;;  %s445_s8 = smov 4  }
  0x22   :  { %48 = dma.hbm_to_vmem [thread:$0]  %s500_s3, 1024, %s43_s28, [#allocation6], %s444_s1, %s444_s1, %s445_s8  }
  0x23   :  { %433 = dma.done.wait [#allocation3], 128  }
  0x24   :  { %434 = vsyncadd [#allocation3], 4294967168 }
  0x25   :  { %435 = dma.done.wait [#allocation6], 1280  }
  0x26   :  { %436 = vsyncadd [#allocation6], 4294966016  ;;  %v446_v0 = vmov 0.0   ;;  %vm447_vm0 = vmmov 0   ;;  %v63_v1 = vld [vmem:[#allocation5 + $0x8] sm:$0xff]  ;;  %v62_v2 = vld [vmem:[#allocation5] sm:$0xff] }
  0x27   :  { %306 = vmatprep.subr.mxu0 %v446_v0  ;;  %310 = vmatprep.mubr.msk.f32.mxu0 %vm447_vm0, %v446_v0  ;;  %v61_v3 = vld [vmem:[#allocation2] sm:$0xff]  ;;  %vm64_vm1 = vcmask 130048   ;;  %v343_v5 = vld [vmem:[#allocation7 + $0x38] sm:$0xff]   ;;  %v344_v7 = vld [vmem:[#allocation7 + $0x30] sm:$0xff]   ;;  %s448_s13 = smov [#allocation8]  }
  0x28   :  { %313 = vmatprep.subr.bf16.mxu1 %v446_v0  ;;  %329 = vmatprep.mubr.msk.bf16.mxu1 %vm447_vm0, %v446_v0  ;;  %v138_v4 = vmul.f32 %v61_v3, %v61_v3  ;;  %v345_v8 = vld [vmem:[#allocation7 + $0x28] sm:$0xff]   ;;  %v346_v9 = vld [vmem:[#allocation7 + $0x20] sm:$0xff]   ;;  %v347_v10 = vld [vmem:[#allocation7 + $0x18] sm:$0xff]   ;;  %s273_s14 = sshll.u32 %s448_s13, 4  ;;  %s274_s14 = int_to_ptr.vmem [resolvable:$true] %s273_s14 }
  0x29   :  { %307 = vmatpush3.msra.mxu0 %v63_v1  ;;  %314 = vmatpush3.bf16.msra.mxu1 %v343_v5  ;;  %v348_v11 = vld [vmem:[#allocation7 + $0x10] sm:$0xff]   ;;  %v349_v12 = vld [vmem:[#allocation7 + $0x8] sm:$0xff]   ;;  %v350_v13 = vld [vmem:[#allocation7] sm:$0xff]   ;;  %p418_p2 = scmp.lt.s32.totalorder %s274_s14, %s274_s14 }
  0x2a   :  { %308 = vmatprep.subr.mxu0 %v446_v0  ;;  %v139_v6 = vsel %vm64_vm1, %v138_v4, 0.0  ;;  %315 = vmatprep.subr.bf16.mxu1 %v446_v0  ;;  %v284_v16 = vld [vmem:[%s499_s2] ss:$0 sm:$0xff]  ;;  %s413_s2 = scalar_lea.vmem %s274_s14, 128 }
  0x2b   :  { %309 = vmatpush3.msra.mxu0 %v62_v2  ;;  %140 = vadd.xlane.f32.xlu0 %v139_v6  ;;  %v285_v24 = vld [vmem:[%s501_s4] ss:$0 sm:$0xff]  ;;  %p414_p1 = scmp.ne.s32.totalorder %s274_s14, %s413_s2  ;;  %p419_p3 = scmp.lt.s32.totalorder %s413_s2, %s413_s2 }
  0x2c   :  { %311 = vmatmul.mubr.msk.f32.vlgmr.msra.gmra.mxu0 %vm64_vm1, %v61_v3 }
  0x2d   :  { %316 = vmatpush3.bf16.msra.mxu1 %v344_v7  ;;  %p420_p4 = por %p419_p3, %p418_p2 }
  0x2e   :  { %317 = vmatprep.subr.bf16.mxu1 %v446_v0 }
  0x2f   :  { %p421_p5 = pnand %p420_p4, %p414_p1 }
  0x31   :  { %318 = vmatpush3.bf16.msra.mxu1 %v345_v8 }
  0x32   :  { %319 = vmatprep.subr.bf16.mxu1 %v446_v0 }
  0x35   :  { %320 = vmatpush3.bf16.msra.mxu1 %v346_v9 }
  0x36   :  { %321 = vmatprep.subr.bf16.mxu1 %v446_v0 }
  0x39   :  { %322 = vmatpush3.bf16.msra.mxu1 %v347_v10 }
  0x3a   :  { %323 = vmatprep.subr.bf16.mxu1 %v446_v0 }
  0x3d   :  { %324 = vmatpush3.bf16.msra.mxu1 %v348_v11 }
  0x3e   :  { %325 = vmatprep.subr.bf16.mxu1 %v446_v0 }
  0x41   :  { %326 = vmatpush3.bf16.msra.mxu1 %v349_v12 }
  0x42   :  { %327 = vmatprep.subr.bf16.mxu1 %v446_v0 }
  0x45   :  { %328 = vmatpush3.bf16.msra.mxu1 %v350_v13 }
  0xb4   :  { %v141_v14 = vpop.xlane.xlu0 %140 }
  0xec   :  { %v134_v15 = vpop.f32.mrf.mxu0 }
  0xed   :  { %v142_v17 = vsub.f32 %v134_v15, %v141_v14 }
  0xee   :  { %v312_v18 = vpop.f32.mrf.mxu0 }
  0xef   :  { %v150_v19 = vadd.f32 %v284_v16, %v142_v17 }
  0xf1   :  { %v151_v20 = vmin.f32 %v150_v19, 0.0 }
  0xf3   :  { %v152_v21 = vmul.f32 1.442695, %v151_v20 }
  0xf5   :  { %351 = vpow2.f32 %v152_v21 }
 0x102   :  { %v352_v22 = vpop.eup %351 }
 0x103   :  { %v154_v23 = vpack.c.bf16 %v352_v22, %v352_v22 }
 0x105   :  { %330 = vmatmul.mubr.bf16.vlgmr.msra.gmra.mxu1 %v154_v23 }
 0x1c5   :  { %v260_v25 = vpop.f32.mrf.mxu1 }
 0x1c6   :  { %v261_v26 = vadd.f32 %v285_v24, %v260_v25 }
 0x1c7   :  { %v331_v27 = vpop.f32.mrf.mxu1 }
 0x1c8   :  { %266 = vst [vmem:[#allocation8] sm:$0xff] %v261_v26 }
 0x1c9   :  { %v263_v28 = vpop.f32.mrf.mxu1 }
 0x1ca   :  { %424 = shalt.err (!%p421_p5)
}
 0x1cb   :  { %276 = dma.vmem_to_hbm [thread:$0]  %s274_s14, 128, %s502_s5, [#allocation4]   ;;  %v332_v29 = vpop.f32.mrf.mxu1 }
 0x1cc   :  { %437 = dma.done.wait [#allocation4], 128  }
 0x1cd   :  { %438 = vsyncadd [#allocation4], 4294967168 }
 0x1ce   :  { %280 = vsyncpa [#allocation3], 1 }
 0x1cf   :  { %281 = vsyncpa [#allocation6], 1 }
 0x1d0   :  { %282 = vsyncpa [#allocation4], 1 }

</bundles_post_ra>
